<compile_context>
chip_gen: v7x
topology: tpu7x:2x2x1
jax: 0.10.0
libtpu: 0.0.40
codegen_flags: <defaults>
</compile_context>

<pallas_src>
import functools

import jax
import jax.numpy as jnp
from jax.experimental import pallas as pl
from jax.experimental.pallas import tpu as pltpu

# ---- tunables --------------------------------------------------------------
_TARGET_BLOCK_BYTES = 4 * 1024 * 1024     # per-array block budget (in+out, double-buffered -> ~16 MiB)
_VMEM_LIMIT_BYTES = 32 * 1024 * 1024      # scoped VMEM request: fits v5e/v6e/v7x
_LANE = 1024                              # lane-dense slab width (multiple of 128)

# ---- shared range reduction + Cephes minimax polynomials (f32) --------------
_TWO_OVER_PI = 0.6366197723675814
_PIO2_A = 1.5703125                       # pi/2 split into exactly-representable parts
_PIO2_B = 4.837512969970703125e-4
_PIO2_C = 7.5497899548918822e-8
_S1, _S2, _S3 = -1.6666654611e-1, 8.3321608736e-3, -1.9515295891e-4
_C1, _C2, _C3 = 4.166664568298827e-2, -1.388731625493765e-3, 2.443315711809948e-5


def _tan_f32(x, *, exact_divide: bool):
    # ONE range reduction shared by both polynomials: x = r + k*pi/2, |r| <= pi/4.
    k = jnp.floor(x * _TWO_OVER_PI + 0.5)
    r = x - k * _PIO2_A
    r = r - k * _PIO2_B
    r = r - k * _PIO2_C
    z = r * r
    sin_r = ((_S3 * z + _S2) * z + _S1) * z * r + r
    cos_r = ((_C3 * z + _C2) * z + _C1) * (z * z) - 0.5 * z + 1.0
    odd = (k.astype(jnp.int32) & 1) == 1          # k odd: tan(x) = -cos(r)/sin(r)
    num = jnp.where(odd, -cos_r, sin_r)
    den = jnp.where(odd, sin_r, cos_r)
    if exact_divide:
        return num / den                          # matches torch.tan most tightly near poles
    inv = pl.reciprocal(den, approx=True)         # EUP seed (otherwise-idle slot)
    inv = inv * (2.0 - den * inv)                 # one Newton step -> ~f32 accuracy away from poles
    return num * inv


def _tan_kernel(x_ref, o_ref, *, exact_divide: bool):
    x = x_ref[...].astype(jnp.float32)            # compute in f32 (no bf16 VPU/EUP on v5e)
    o_ref[...] = _tan_f32(x, exact_divide=exact_divide).astype(o_ref.dtype)


# ---- wrapper ----------------------------------------------------------------
def _round_up(n: int, m: int) -> int:
    return ((n + m - 1) // m) * m


def _choose_row_tile(rows: int, lane: int, itemsize: int) -> int:
    budget_rows = max(8, (_TARGET_BLOCK_BYTES // (lane * itemsize)) // 8 * 8)
    tile_rows = min(budget_rows, rows)
    if rows >= 16:
        # Guarantee >= 2 blocks on the "parallel" axis so both v7x TCs get work.
        half = _round_up(-(-rows // 2), 8)
        tile_rows = min(tile_rows, half)
    if tile_rows != rows and tile_rows % 8 != 0:
        tile_rows = max(8, (tile_rows // 8) * 8)
    return tile_rows


def tan_operation_node_forward(batch: jax.Array, *, exact_divide: bool = False) -> jax.Array:
    """Pallas equivalent of TanOperationNode.forward (child = identity pull-up)."""
    orig_shape = batch.shape
    dtype = batch.dtype
    total = int(batch.size)
    if total == 0:
        return batch

    # Lane-dense slab: elementwise op, so flatten + pad to a multiple of `lane`
    # -> unmasked full-width vector stores for any caller-supplied F.
    lane = min(_LANE, _round_up(total, 128))
    padded = _round_up(total, lane)
    flat = batch.reshape(-1)
    if padded != total:
        flat = jnp.pad(flat, (0, padded - total))
    rows = padded // lane
    slab = flat.reshape(rows, lane)

    itemsize = jnp.dtype(dtype).itemsize
    tile_rows = _choose_row_tile(rows, lane, itemsize)
    grid = (pl.cdiv(rows, tile_rows),)

    cost = pl.CostEstimate(
        flops=32 * padded,                # range reduction + 2 polynomials + Newton (VALU-bound)
        transcendentals=padded,           # EUP reciprocal seed
        bytes_accessed=2 * padded * itemsize,
    )

    # TODO(synk): sweep pipeline_mode=pl.Buffered(3) on v7x once compute per block shrinks further.
    out = pl.pallas_call(
        functools.partial(_tan_kernel, exact_divide=exact_divide),
        out_shape=jax.ShapeDtypeStruct((rows, lane), dtype),
        grid_spec=pl.GridSpec(
            grid=grid,
            in_specs=[pl.BlockSpec((tile_rows, lane), lambda i: (i, 0))],
            out_specs=pl.BlockSpec((tile_rows, lane), lambda i: (i, 0)),
        ),
        compiler_params=pltpu.CompilerParams(
            dimension_semantics=("parallel",),
            vmem_limit_bytes=_VMEM_LIMIT_BYTES,
        ),
        cost_estimate=cost,
    )(slab)

    out_flat = out.reshape(-1)
    if padded != total:
        out_flat = out_flat[:total]
    return out_flat.reshape(orig_shape)


if __name__ == "__main__":
    key = jax.random.PRNGKey(0)
    k1, k2 = jax.random.split(key)

    # 8 samples x 256 features: single lane-dense block, default fast path.
    x = jax.random.uniform(k1, (8, 256), dtype=jnp.float32, minval=-1.0, maxval=1.0)
    out = jax.block_until_ready(tan_operation_node_forward(x))
    ref = jnp.tan(x)
    assert out.shape == ref.shape and out.dtype == ref.dtype
    assert jnp.max(jnp.abs(out - ref)) < 1e-4

    # Non-128-multiple feature width: exercises flatten/pad + multi-block grid.
    x2 = jax.random.uniform(k2, (64, 300), dtype=jnp.float32, minval=-1.2, maxval=1.2)
    out2 = jax.block_until_ready(tan_operation_node_forward(x2))
    ref2 = jnp.tan(x2)
    assert jnp.max(jnp.abs(out2 - ref2)) < 1e-4

    # Exact-divide path for tight agreement with jnp.tan / torch.tan semantics.
    out3 = jax.block_until_ready(tan_operation_node_forward(x2, exact_divide=True))
    assert jnp.max(jnp.abs(out3 - ref2)) < 1e-5

    print("KERNEL_OK")
</pallas_src>

<mosaic_0001>
module attributes {stable_mosaic.version = 11 : i64} {
  func.func @_tan_kernel(%arg0: i32, %arg1: memref<2x1024xf32, #tpu.memory_space<vmem>>, %arg2: memref<2x1024xf32, #tpu.memory_space<vmem>>) attributes {dimension_semantics = [#tpu.dimension_semantics<parallel>], iteration_bounds = array<i64: 1>, scalar_prefetch = 0 : i64, scratch_operands = 0 : i64, tpu.core_type = #tpu.core_type<tc>, window_params = [{transform_indices = @transform_0, window_bounds = array<i64: 2, 1024>}, {transform_indices = @transform_1, window_bounds = array<i64: 2, 1024>}]} {
    %c0 = arith.constant 0 : index
    %c0_0 = arith.constant 0 : index
    %0 = vector.load %arg1[%c0, %c0_0] : memref<2x1024xf32, #tpu.memory_space<vmem>>, vector<2x1024xf32>
    %cst = arith.constant 0.636619746 : f32
    %1 = vector.broadcast %cst : f32 to vector<2x1024xf32>
    %2 = arith.mulf %0, %1 : vector<2x1024xf32>
    %cst_1 = arith.constant 5.000000e-01 : f32
    %3 = vector.broadcast %cst_1 : f32 to vector<2x1024xf32>
    %4 = arith.addf %2, %3 : vector<2x1024xf32>
    %5 = math.floor %4 : vector<2x1024xf32>
    %cst_2 = arith.constant 1.5703125 : f32
    %6 = vector.broadcast %cst_2 : f32 to vector<2x1024xf32>
    %7 = arith.mulf %5, %6 : vector<2x1024xf32>
    %8 = arith.subf %0, %7 : vector<2x1024xf32>
    %cst_3 = arith.constant 4.83751297E-4 : f32
    %9 = vector.broadcast %cst_3 : f32 to vector<2x1024xf32>
    %10 = arith.mulf %5, %9 : vector<2x1024xf32>
    %11 = arith.subf %8, %10 : vector<2x1024xf32>
    %cst_4 = arith.constant 7.549790e-08 : f32
    %12 = vector.broadcast %cst_4 : f32 to vector<2x1024xf32>
    %13 = arith.mulf %5, %12 : vector<2x1024xf32>
    %14 = arith.subf %11, %13 : vector<2x1024xf32>
    %15 = arith.mulf %14, %14 : vector<2x1024xf32>
    %cst_5 = arith.constant -1.95152956E-4 : f32
    %16 = vector.broadcast %cst_5 : f32 to vector<2x1024xf32>
    %17 = arith.mulf %16, %15 : vector<2x1024xf32>
    %cst_6 = arith.constant 0.00833216123 : f32
    %18 = vector.broadcast %cst_6 : f32 to vector<2x1024xf32>
    %19 = arith.addf %17, %18 : vector<2x1024xf32>
    %20 = arith.mulf %19, %15 : vector<2x1024xf32>
    %cst_7 = arith.constant -0.166666552 : f32
    %21 = vector.broadcast %cst_7 : f32 to vector<2x1024xf32>
    %22 = arith.addf %20, %21 : vector<2x1024xf32>
    %23 = arith.mulf %22, %15 : vector<2x1024xf32>
    %24 = arith.mulf %23, %14 : vector<2x1024xf32>
    %25 = arith.addf %24, %14 : vector<2x1024xf32>
    %cst_8 = arith.constant 2.44331568E-5 : f32
    %26 = vector.broadcast %cst_8 : f32 to vector<2x1024xf32>
    %27 = arith.mulf %26, %15 : vector<2x1024xf32>
    %cst_9 = arith.constant -0.00138873165 : f32
    %28 = vector.broadcast %cst_9 : f32 to vector<2x1024xf32>
    %29 = arith.addf %27, %28 : vector<2x1024xf32>
    %30 = arith.mulf %29, %15 : vector<2x1024xf32>
    %cst_10 = arith.constant 0.0416666456 : f32
    %31 = vector.broadcast %cst_10 : f32 to vector<2x1024xf32>
    %32 = arith.addf %30, %31 : vector<2x1024xf32>
    %33 = arith.mulf %15, %15 : vector<2x1024xf32>
    %34 = arith.mulf %32, %33 : vector<2x1024xf32>
    %cst_11 = arith.constant 5.000000e-01 : f32
    %35 = vector.broadcast %cst_11 : f32 to vector<2x1024xf32>
    %36 = arith.mulf %35, %15 : vector<2x1024xf32>
    %37 = arith.subf %34, %36 : vector<2x1024xf32>
    %cst_12 = arith.constant 1.000000e+00 : f32
    %38 = vector.broadcast %cst_12 : f32 to vector<2x1024xf32>
    %39 = arith.addf %37, %38 : vector<2x1024xf32>
    %40 = arith.fptosi %5 : vector<2x1024xf32> to vector<2x1024xi32>
    %c1_i32 = arith.constant 1 : i32
    %41 = vector.broadcast %c1_i32 : i32 to vector<2x1024xi32>
    %42 = arith.andi %40, %41 : vector<2x1024xi32>
    %c1_i32_13 = arith.constant 1 : i32
    %43 = vector.broadcast %c1_i32_13 : i32 to vector<2x1024xi32>
    %44 = arith.cmpi eq, %42, %43 : vector<2x1024xi32>
    %cst_14 = arith.constant 0.000000e+00 : f32
    %45 = vector.broadcast %cst_14 : f32 to vector<2x1024xf32>
    %46 = arith.subf %45, %39 : vector<2x1024xf32>
    %47 = arith.select %44, %46, %25 : vector<2x1024xi1>, vector<2x1024xf32>
    %48 = arith.select %44, %25, %39 : vector<2x1024xi1>, vector<2x1024xf32>
    %49 = tpu.reciprocal %48 {approx = true} : vector<2x1024xf32> -> vector<2x1024xf32>
    %50 = arith.mulf %48, %49 : vector<2x1024xf32>
    %cst_15 = arith.constant 2.000000e+00 : f32
    %51 = vector.broadcast %cst_15 : f32 to vector<2x1024xf32>
    %52 = arith.subf %51, %50 : vector<2x1024xf32>
    %53 = arith.mulf %49, %52 : vector<2x1024xf32>
    %54 = arith.mulf %47, %53 : vector<2x1024xf32>
    %c0_16 = arith.constant 0 : index
    %c0_17 = arith.constant 0 : index
    %55 = vector.load %arg2[%c0_16, %c0_17] : memref<2x1024xf32, #tpu.memory_space<vmem>>, vector<2x1024xf32>
    tpu.vector_store %arg2[%c0_16, %c0_17], %54 {strides = array<i32>} : memref<2x1024xf32, #tpu.memory_space<vmem>>, vector<2x1024xf32>,
    return
  }
  func.func @transform_0(%arg0: i32) -> (i32, i32) {
    %c0_i32 = arith.constant 0 : i32
    %c0_i32_0 = arith.constant 0 : i32
    return %arg0, %c0_i32 : i32, i32
  }
  func.func @transform_1(%arg0: i32) -> (i32, i32) {
    %c0_i32 = arith.constant 0 : i32
    %c0_i32_0 = arith.constant 0 : i32
    return %arg0, %c0_i32 : i32, i32
  }
}

</mosaic_0001>

<bundles_post_ra>
// kernel: tpu_custom_call.1
= control target key start
LH: loop header
LB: loop body
LE: loop exit
PB: predicated region body
PF: predicated region fallthrough
CT: control target
= control target key end

     0   :  { %6 = vsyncpa [#allocation3], 0  ;;  %s224_s0 = inlined_call_operand.hbm [shape: f32[2,1024], index: 0, kind: input, shape index: {}]   ;;  %s225_s1 = inlined_call_operand.hbm [shape: f32[2,1024], index: 1, kind: output, shape index: {}]  }
   0x1   :  { %7 = vsyncpa [#allocation4], 0  ;;  %s172_s6 = smov [#allocation2]   ;;  %s124_s10 = scalar_lea.hbm %s224_s0, 256 }
   0x2   :  { %s14_s7 = sshll.u32 %s172_s6, 4  ;;  %p125_p0 = scmp.ne.s32.totalorder %s224_s0, %s124_s10  ;;  %s15_s7 = int_to_ptr.vmem [resolvable:$true] %s14_s7 }
   0x3   :  { %p128_p1 = scmp.lt.u32.totalorder %s124_s10, %s224_s0 }
   0x5   :  { %p130_p2 = pnand %p128_p1, %p125_p0 }
   0x7   :  { %133 = shalt.err (!%p130_p2)
}
   0x8   :  { %s134_s15 = scalar_lea.vmem %s15_s7, 256  ;;  %p139_p4 = scmp.lt.s32.totalorder %s15_s7, %s15_s7 }
   0x9   :  { %p135_p3 = scmp.ne.s32.totalorder %s15_s7, %s134_s15  ;;  %p140_p5 = scmp.lt.s32.totalorder %s134_s15, %s134_s15 }
   0xb   :  { %p141_p6 = por %p140_p5, %p139_p4 }
   0xd   :  { %p142_p7 = pnand %p141_p6, %p135_p3 }
   0xf   :  { %145 = shalt.err (!%p142_p7)
}
  0x10   :  { %17 = dma.hbm_to_vmem [thread:$0]  %s224_s0, 256, %s15_s7, [#allocation3]  }
  0x11   :  { %168 = dma.done.wait [#allocation3], 256  }
  0x12   :  { %169 = vsyncadd [#allocation3], 4294967040  ;;  %v21_v0 = vld [vmem:[#allocation2] sm:$0xff]  ;;  %v22_v1 = vld [vmem:[#allocation2 + $0x8] sm:$0xff]  ;;  %s173_s0 = smov [#allocation5]  }
  0x13   :  { %v23_v2 = vmul.f32 0.63661975, %v21_v0  ;;  %v24_v3 = vmul.f32 0.63661975, %v22_v1  ;;  %s105_s18 = sshll.u32 %s173_s0, 4  ;;  %s106_s18 = int_to_ptr.vmem [resolvable:$true] %s105_s18 }
  0x14   :  { %s146_s19 = scalar_lea.vmem %s106_s18, 256  ;;  %p151_p9 = scmp.lt.s32.totalorder %s106_s18, %s106_s18 }
  0x15   :  { %v25_v4 = vadd.f32 0.5, %v23_v2  ;;  %v26_v5 = vadd.f32 0.5, %v24_v3  ;;  %p147_p8 = scmp.ne.s32.totalorder %s106_s18, %s146_s19  ;;  %p152_p10 = scmp.lt.s32.totalorder %s146_s19, %s146_s19 }
  0x17   :  { %v27_v6 = vfloor.f32 %v25_v4  ;;  %v28_v7 = vfloor.f32 %v26_v5  ;;  %p153_p11 = por %p152_p10, %p151_p9 }
  0x19   :  { %v29_v8 = vmul.f32 1.5703125, %v27_v6  ;;  %v33_v9 = vmul.f32 0.0004837513, %v27_v6  ;;  %v30_v10 = vmul.f32 1.5703125, %v28_v7  ;;  %v34_v11 = vmul.f32 0.0004837513, %v28_v7  ;;  %p154_p12 = pnand %p153_p11, %p147_p8 }
  0x1a   :  { %v37_v13 = vmul.f32 7.54979e-08, %v27_v6  ;;  %v38_v15 = vmul.f32 7.54979e-08, %v28_v7  ;;  %v114_v21 = vtrunc.f32 %v27_v6  ;;  %v116_v25 = vtrunc.f32 %v28_v7 }
  0x1b   :  { %v31_v12 = vsub.f32 %v21_v0, %v29_v8  ;;  %v32_v14 = vsub.f32 %v22_v1, %v30_v10 }
  0x1c   :  { %v115_v30 = vcvt.f32.s32 %v114_v21  ;;  %v117_v36 = vcvt.f32.s32 %v116_v25 }
  0x1d   :  { %v35_v16 = vsub.f32 %v31_v12, %v33_v9  ;;  %v36_v17 = vsub.f32 %v32_v14, %v34_v11 }
  0x1e   :  { %v77_v43 = vand.u32 1, %v115_v30  ;;  %v78_v49 = vand.u32 1, %v117_v36 }
  0x1f   :  { %v39_v18 = vsub.f32 %v35_v16, %v37_v13  ;;  %v40_v19 = vsub.f32 %v36_v17, %v38_v15 }
  0x20   :  { %vm196_vm0 = vcmp.eq.s32.totalorder %v77_v43, 1  ;;  %vm200_vm1 = vcmp.eq.s32.totalorder %v78_v49, 1 }
  0x21   :  { %v41_v20 = vmul.f32 %v39_v18, %v39_v18  ;;  %v42_v22 = vmul.f32 %v40_v19, %v40_v19 }
  0x23   :  { %v43_v23 = vmul.f32 -0.00019515296, %v41_v20  ;;  %v57_v24 = vmul.f32 2.4433157e-05, %v41_v20  ;;  %v44_v26 = vmul.f32 -0.00019515296, %v42_v22  ;;  %v65_v35 = vmul.f32 %v41_v20, %v41_v20 }
  0x24   :  { %v58_v27 = vmul.f32 2.4433157e-05, %v42_v22  ;;  %v66_v39 = vmul.f32 %v42_v22, %v42_v22  ;;  %v69_v42 = vmul.f32 0.5, %v41_v20  ;;  %v70_v46 = vmul.f32 0.5, %v42_v22 }
  0x25   :  { %v45_v28 = vadd.f32 0.008332161, %v43_v23  ;;  %v59_v29 = vadd.f32 -0.0013887316, %v57_v24  ;;  %v46_v31 = vadd.f32 0.008332161, %v44_v26 }
  0x26   :  { %v60_v32 = vadd.f32 -0.0013887316, %v58_v27 }
  0x27   :  { %v47_v33 = vmul.f32 %v45_v28, %v41_v20  ;;  %v61_v34 = vmul.f32 %v59_v29, %v41_v20  ;;  %v48_v37 = vmul.f32 %v46_v31, %v42_v22 }
  0x28   :  { %v62_v38 = vmul.f32 %v60_v32, %v42_v22 }
  0x29   :  { %v49_v40 = vadd.f32 -0.16666655, %v47_v33  ;;  %v63_v41 = vadd.f32 0.041666646, %v61_v34  ;;  %v50_v44 = vadd.f32 -0.16666655, %v48_v37 }
  0x2a   :  { %v64_v45 = vadd.f32 0.041666646, %v62_v38 }
  0x2b   :  { %v51_v47 = vmul.f32 %v49_v40, %v41_v20  ;;  %v67_v48 = vmul.f32 %v65_v35, %v63_v41  ;;  %v52_v50 = vmul.f32 %v50_v44, %v42_v22 }
  0x2c   :  { %v68_v51 = vmul.f32 %v66_v39, %v64_v45 }
  0x2d   :  { %v53_v52 = vmul.f32 %v51_v47, %v39_v18  ;;  %v71_v53 = vsub.f32 %v67_v48, %v69_v42  ;;  %v54_v55 = vmul.f32 %v52_v50, %v40_v19 }
  0x2e   :  { %v72_v56 = vsub.f32 %v68_v51, %v70_v46 }
  0x2f   :  { %v55_v57 = vadd.f32 %v53_v52, %v39_v18  ;;  %v73_v58 = vadd.f32 1.0, %v71_v53  ;;  %v56_v60 = vadd.f32 %v54_v55, %v40_v19 }
  0x30   :  { %v74_v61 = vadd.f32 1.0, %v72_v56 }
  0x31   :  { %v85_v62 = vsel %vm196_vm0, %v55_v57, %v73_v58  ;;  %v81_v1 = vsub.f32 0.0, %v73_v58 }
  0x32   :  { %120 = vrcp.f32 %v85_v62  ;;  %v86_v63 = vsel %vm200_vm1, %v56_v60, %v74_v61  ;;  %v82_v4 = vsub.f32 0.0, %v74_v61 }
  0x33   :  { %122 = vrcp.f32 %v86_v63  ;;  %v83_v7 = vsel %vm196_vm0, %v81_v1, %v55_v57 }
  0x34   :  { %v84_v10 = vsel %vm200_vm1, %v82_v4, %v56_v60 }
  0x3c   :  { %v121_v0 = vpop.eup %120 }
  0x3d   :  { %v123_v2 = vpop.eup %122  ;;  %v89_v3 = vmul.f32 %v121_v0, %v85_v62 }
  0x3e   :  { %v90_v5 = vmul.f32 %v123_v2, %v86_v63 }
  0x3f   :  { %v91_v6 = vsub.f32 2.0, %v89_v3 }
  0x40   :  { %v92_v8 = vsub.f32 2.0, %v90_v5 }
  0x41   :  { %v93_v9 = vmul.f32 %v121_v0, %v91_v6 }
  0x42   :  { %v94_v11 = vmul.f32 %v123_v2, %v92_v8 }
  0x43   :  { %v95_v12 = vmul.f32 %v93_v9, %v83_v7 }
  0x44   :  { %v96_v13 = vmul.f32 %v94_v11, %v84_v10 }
  0x45   :  { %97 = vst [vmem:[#allocation5] sm:$0xff] %v95_v12 }
  0x46   :  { %98 = vst [vmem:[#allocation5 + $0x8] sm:$0xff] %v96_v13 }
  0x47   :  { %157 = shalt.err (!%p154_p12)
}
  0x48   :  { %s158_s22 = scalar_lea.hbm %s225_s1, 256 }
  0x49   :  { %p159_p13 = scmp.ne.s32.totalorder %s225_s1, %s158_s22  ;;  %p162_p0 = scmp.lt.u32.totalorder %s158_s22, %s225_s1 }
  0x4b   :  { %p164_p1 = pnand %p162_p0, %p159_p13 }
  0x4d   :  { %167 = shalt.err (!%p164_p1)
}
  0x4e   :  { %108 = dma.vmem_to_hbm [thread:$0]  %s106_s18, 256, %s225_s1, [#allocation4]  }
  0x4f   :  { %170 = dma.done.wait [#allocation4], 256  }
  0x50   :  { %171 = vsyncadd [#allocation4], 4294967040 }
  0x51   :  { %112 = vsyncpa [#allocation3], 1 }
  0x52   :  { %113 = vsyncpa [#allocation4], 1 }

</bundles_post_ra>
